<compile_context>
chip_gen: v6e
topology: v6e:2x2x1
jax: 0.10.0
libtpu: 0.0.40
codegen_flags: <defaults>
</compile_context>

<pallas_src>
import functools
import math

import numpy as np
import jax
import jax.numpy as jnp
from jax import lax
from jax.experimental import pallas as pl
from jax.experimental.pallas import tpu as pltpu


def _cluster_loss_kernel(ci_ref, cj_ref, out_ref, *,
                         class_num, temperature, con):
    K = class_num
    N = 2 * K
    inv_temp = jnp.float32(1.0 / temperature)

    ci = ci_ref[...].astype(jnp.float32)            # (B, K)  == torch c_i
    cj = cj_ref[...].astype(jnp.float32)            # (B, K)  == torch c_j

    # ---------------- entropy (ne) regularizer ----------------
    def _neg_entropy(c):
        p = jnp.sum(c, axis=0, keepdims=True)       # (1, K) == c.sum(0)
        p = p / jnp.sum(p)
        # 0 * log 0 -> 0 guard (free VPU select); torch would NaN here.
        plogp = jnp.where(p > 0.0, p * jnp.log(jnp.where(p > 0.0, p, 1.0)), 0.0)
        return math.log(K) + jnp.sum(plogp)

    ne_loss = _neg_entropy(ci) + _neg_entropy(cj)

    # ---------------- per-prototype normalization ----------------
    # Columns of ci/cj are the rows of torch's `c`; normalize each column so
    # the gram matrix is directly the cosine-similarity matrix.
    sq_i = jnp.sum(ci * ci, axis=0, keepdims=True)  # (1, K) squared norms
    sq_j = jnp.sum(cj * cj, axis=0, keepdims=True)
    ci_hat = ci * lax.rsqrt(jnp.maximum(sq_i, 1e-16))
    cj_hat = cj * lax.rsqrt(jnp.maximum(sq_j, 1e-16))
    cc_hat = jnp.concatenate([ci_hat, cj_hat], axis=1)      # (B, N)

    # ---------------- cosine-similarity matrix (MXU) ----------------
    # sim = (c_hat @ c_hat^T) / T, computed as cc_hat^T @ cc_hat (contract the
    # batch axis directly; no wrapper-side transpose/concat).
    sim = lax.dot_general(
        cc_hat, cc_hat,
        dimension_numbers=(((0,), (0,)), ((), ())),
        preferred_element_type=jnp.float32) * inv_temp       # (N, N)

    # ---------------- positive-pair term ----------------
    # sim[i, K+i] == sim[K+i, i] == cos(c_i[:,i], c_j[:,i]) / T  -> sum of both
    # off-diagonals equals 2 * sum_k <ci_hat_k, cj_hat_k> / T.
    pos_sum = 2.0 * inv_temp * jnp.sum(ci_hat * cj_hat)

    # ---------------- NT-Xent cross entropy ----------------
    # CE_i = -pos_i + logsumexp over (row i of sim minus its diagonal entry).
    # Every sim entry <= 1/T and the diagonal equals 1/T exactly, so use the
    # compile-time constant 1/T as the row max and exclude the diagonal by
    # subtracting exp(0) == 1 from the full-row exp-sum.  No (N,N) max, no
    # iotas, no masks.
    s = jnp.sum(jnp.exp(sim - inv_temp), axis=1, keepdims=True)   # (N, 1)
    s_excl = jnp.maximum(s - 1.0, 1e-30)                          # guard log(<=0)
    lse_sum = N * inv_temp + jnp.sum(jnp.log(s_excl))

    ce_sum = lse_sum - pos_sum                       # CE(reduction='sum')
    loss = ce_sum / N

    total = (loss + ne_loss) * jnp.float32(con)
    out_ref[...] = jnp.broadcast_to(total, (1, 1)).astype(jnp.float32)


def cluster_loss(c_i, c_j, con, *, class_num, temperature):
    """c_i, c_j: (batch, class_num) soft cluster assignments. con: scalar weight."""
    B, K = c_i.shape
    N = 2 * K

    # Bake `con` into the kernel when it is a static Python scalar (drops the
    # SMEM operand + wrapper ops).  A traced `con` is applied outside.
    con_is_static = isinstance(con, (int, float))
    con_static = float(con) if con_is_static else 1.0

    kernel = functools.partial(_cluster_loss_kernel,
                               class_num=class_num,
                               temperature=temperature,
                               con=con_static)
    cost = pl.CostEstimate(
        flops=int(2 * B * N * N + 8 * B * N + 3 * N * N),
        transcendentals=int(N * N + N + 2 * K + 2),
        bytes_accessed=int(2 * B * K * c_i.dtype.itemsize + 4),
    )
    out = pl.pallas_call(
        kernel,
        out_shape=jax.ShapeDtypeStruct((1, 1), jnp.float32),
        in_specs=[
            pl.BlockSpec(memory_space=pltpu.MemorySpace.VMEM),   # c_i (B, K)
            pl.BlockSpec(memory_space=pltpu.MemorySpace.VMEM),   # c_j (B, K)
        ],
        out_specs=pl.BlockSpec(memory_space=pltpu.MemorySpace.VMEM),
        cost_estimate=cost,
    )(c_i, c_j)
    result = out[0, 0]
    if not con_is_static:
        result = result * jnp.asarray(con, jnp.float32)
    return result


def reference_loss_np(c_i, c_j, con, class_num, temperature):
    """Numpy mirror of the PyTorch forward (for a correctness check)."""
    c_i = np.asarray(c_i, np.float64)
    c_j = np.asarray(c_j, np.float64)
    K = class_num
    N = 2 * K
    p_i = c_i.sum(0); p_i = p_i / p_i.sum()
    ne_i = math.log(K) + (p_i * np.log(p_i)).sum()
    p_j = c_j.sum(0); p_j = p_j / p_j.sum()
    ne_j = math.log(K) + (p_j * np.log(p_j)).sum()
    c = np.concatenate([c_i.T, c_j.T], axis=0)
    norms = np.linalg.norm(c, axis=1)
    sim = (c @ c.T) / np.maximum(np.outer(norms, norms), 1e-8) / temperature
    pos = np.concatenate([np.diag(sim, K), np.diag(sim, -K)]).reshape(N, 1)
    mask = np.ones((N, N), bool)
    np.fill_diagonal(mask, False)
    for i in range(K):
        mask[i, K + i] = False
        mask[K + i, i] = False
    neg = sim[mask].reshape(N, -1)
    logits = np.concatenate([pos, neg], axis=1)
    m = logits.max(1, keepdims=True)
    lse = m[:, 0] + np.log(np.exp(logits - m).sum(1))
    loss = (lse - logits[:, 0]).sum() / N           # CE(label=0, reduction='sum') / N
    return (loss + ne_i + ne_j) * con


if __name__ == "__main__":
    class_num = 8
    batch = 32
    temperature = 1.0
    con = 0.5

    key = jax.random.PRNGKey(0)
    k1, k2 = jax.random.split(key)
    # soft cluster assignments (rows sum to 1), like the outputs of a cluster head
    c_i = jax.nn.softmax(jax.random.normal(k1, (batch, class_num), jnp.float32), axis=-1)
    c_j = jax.nn.softmax(jax.random.normal(k2, (batch, class_num), jnp.float32), axis=-1)

    out = cluster_loss(c_i, c_j, con, class_num=class_num, temperature=temperature)
    out = jax.block_until_ready(out)

    ref = reference_loss_np(np.asarray(c_i), np.asarray(c_j), con, class_num, temperature)
    assert abs(float(out) - float(ref)) < 1e-3, (float(out), float(ref))

    print("KERNEL_OK")
</pallas_src>

<mosaic_0001>
module attributes {stable_mosaic.version = 11 : i64} {
  func.func @_cluster_loss_kernel(%arg0: memref<32x8xf32, #tpu.memory_space<vmem>>, %arg1: memref<32x8xf32, #tpu.memory_space<vmem>>, %arg2: memref<1x1xf32, #tpu.memory_space<vmem>>) attributes {dimension_semantics = [], scalar_prefetch = 0 : i64, scratch_operands = 0 : i64, tpu.core_type = #tpu.core_type<tc>} {
    %c0 = arith.constant 0 : index
    %c0_0 = arith.constant 0 : index
    %0 = vector.load %arg0[%c0, %c0_0] : memref<32x8xf32, #tpu.memory_space<vmem>>, vector<32x8xf32>
    %c0_1 = arith.constant 0 : index
    %c0_2 = arith.constant 0 : index
    %1 = vector.load %arg1[%c0_1, %c0_2] : memref<32x8xf32, #tpu.memory_space<vmem>>, vector<32x8xf32>
    %cst = arith.constant dense<0.000000e+00> : vector<8xf32>
    %2 = vector.multi_reduction <add>, %0, %cst [0] : vector<32x8xf32> to vector<8xf32>
    %3 = vector.shape_cast %2 : vector<8xf32> to vector<1x8xf32>
    %4 = vector.shape_cast %3 : vector<1x8xf32> to vector<1x1x8xf32>
    %cst_3 = arith.constant dense<0.000000e+00> : vector<1xf32>
    %5 = vector.multi_reduction <add>, %4, %cst_3 [1, 2] : vector<1x1x8xf32> to vector<1xf32>
    %6 = vector.shape_cast %5 : vector<1xf32> to vector<1x1x1xf32>
    %7 = vector.extract %6[0, 0, 0] : f32 from vector<1x1x1xf32>
    %8 = vector.broadcast %7 : f32 to vector<1x8xf32>
    %9 = arith.divf %3, %8 : vector<1x8xf32>
    %cst_4 = arith.constant 0.000000e+00 : f32
    %10 = vector.broadcast %cst_4 : f32 to vector<1x8xf32>
    %11 = arith.cmpf ogt, %9, %10 : vector<1x8xf32>
    %cst_5 = arith.constant 0.000000e+00 : f32
    %12 = vector.broadcast %cst_5 : f32 to vector<1x8xf32>
    %13 = arith.cmpf ogt, %9, %12 : vector<1x8xf32>
    %cst_6 = arith.constant 1.000000e+00 : f32
    %14 = vector.broadcast %cst_6 : f32 to vector<1x8xf32>
    %15 = arith.select %13, %9, %14 : vector<1x8xi1>, vector<1x8xf32>
    %16 = math.log %15 : vector<1x8xf32>
    %17 = arith.mulf %9, %16 : vector<1x8xf32>
    %cst_7 = arith.constant 0.000000e+00 : f32
    %18 = vector.broadcast %cst_7 : f32 to vector<1x8xf32>
    %19 = arith.select %11, %17, %18 : vector<1x8xi1>, vector<1x8xf32>
    %20 = vector.shape_cast %19 : vector<1x8xf32> to vector<1x1x8xf32>
    %cst_8 = arith.constant dense<0.000000e+00> : vector<1xf32>
    %21 = vector.multi_reduction <add>, %20, %cst_8 [1, 2] : vector<1x1x8xf32> to vector<1xf32>
    %22 = vector.shape_cast %21 : vector<1xf32> to vector<1x1x1xf32>
    %23 = vector.extract %22[0, 0, 0] : f32 from vector<1x1x1xf32>
    %cst_9 = arith.constant 2.07944155 : f32
    %24 = arith.addf %cst_9, %23 : f32
    %cst_10 = arith.constant dense<0.000000e+00> : vector<8xf32>
    %25 = vector.multi_reduction <add>, %1, %cst_10 [0] : vector<32x8xf32> to vector<8xf32>
    %26 = vector.shape_cast %25 : vector<8xf32> to vector<1x8xf32>
    %27 = vector.shape_cast %26 : vector<1x8xf32> to vector<1x1x8xf32>
    %cst_11 = arith.constant dense<0.000000e+00> : vector<1xf32>
    %28 = vector.multi_reduction <add>, %27, %cst_11 [1, 2] : vector<1x1x8xf32> to vector<1xf32>
    %29 = vector.shape_cast %28 : vector<1xf32> to vector<1x1x1xf32>
    %30 = vector.extract %29[0, 0, 0] : f32 from vector<1x1x1xf32>
    %31 = vector.broadcast %30 : f32 to vector<1x8xf32>
    %32 = arith.divf %26, %31 : vector<1x8xf32>
    %cst_12 = arith.constant 0.000000e+00 : f32
    %33 = vector.broadcast %cst_12 : f32 to vector<1x8xf32>
    %34 = arith.cmpf ogt, %32, %33 : vector<1x8xf32>
    %cst_13 = arith.constant 0.000000e+00 : f32
    %35 = vector.broadcast %cst_13 : f32 to vector<1x8xf32>
    %36 = arith.cmpf ogt, %32, %35 : vector<1x8xf32>
    %cst_14 = arith.constant 1.000000e+00 : f32
    %37 = vector.broadcast %cst_14 : f32 to vector<1x8xf32>
    %38 = arith.select %36, %32, %37 : vector<1x8xi1>, vector<1x8xf32>
    %39 = math.log %38 : vector<1x8xf32>
    %40 = arith.mulf %32, %39 : vector<1x8xf32>
    %cst_15 = arith.constant 0.000000e+00 : f32
    %41 = vector.broadcast %cst_15 : f32 to vector<1x8xf32>
    %42 = arith.select %34, %40, %41 : vector<1x8xi1>, vector<1x8xf32>
    %43 = vector.shape_cast %42 : vector<1x8xf32> to vector<1x1x8xf32>
    %cst_16 = arith.constant dense<0.000000e+00> : vector<1xf32>
    %44 = vector.multi_reduction <add>, %43, %cst_16 [1, 2] : vector<1x1x8xf32> to vector<1xf32>
    %45 = vector.shape_cast %44 : vector<1xf32> to vector<1x1x1xf32>
    %46 = vector.extract %45[0, 0, 0] : f32 from vector<1x1x1xf32>
    %cst_17 = arith.constant 2.07944155 : f32
    %47 = arith.addf %cst_17, %46 : f32
    %48 = arith.addf %24, %47 : f32
    %49 = arith.mulf %0, %0 : vector<32x8xf32>
    %cst_18 = arith.constant dense<0.000000e+00> : vector<8xf32>
    %50 = vector.multi_reduction <add>, %49, %cst_18 [0] : vector<32x8xf32> to vector<8xf32>
    %51 = vector.shape_cast %50 : vector<8xf32> to vector<1x8xf32>
    %52 = arith.mulf %1, %1 : vector<32x8xf32>
    %cst_19 = arith.constant dense<0.000000e+00> : vector<8xf32>
    %53 = vector.multi_reduction <add>, %52, %cst_19 [0] : vector<32x8xf32> to vector<8xf32>
    %54 = vector.shape_cast %53 : vector<8xf32> to vector<1x8xf32>
    %cst_20 = arith.constant 1.000000e-16 : f32
    %55 = vector.broadcast %cst_20 : f32 to vector<1x8xf32>
    %56 = arith.maximumf %51, %55 : vector<1x8xf32>
    %57 = math.rsqrt %56 : vector<1x8xf32>
    %58 = vector.broadcast %57 : vector<1x8xf32> to vector<32x8xf32>
    %59 = arith.mulf %0, %58 : vector<32x8xf32>
    %cst_21 = arith.constant 1.000000e-16 : f32
    %60 = vector.broadcast %cst_21 : f32 to vector<1x8xf32>
    %61 = arith.maximumf %54, %60 : vector<1x8xf32>
    %62 = math.rsqrt %61 : vector<1x8xf32>
    %63 = vector.broadcast %62 : vector<1x8xf32> to vector<32x8xf32>
    %64 = arith.mulf %1, %63 : vector<32x8xf32>
    %65 = tpu.concatenate %59, %64 in 1 : vector<32x8xf32>, vector<32x8xf32> -> vector<32x16xf32>
    %cst_22 = arith.constant dense<0.000000e+00> : vector<16x16xf32>
    %66 = tpu.matmul %65, %65, %cst_22 {dimension_numbers = #tpu.dot_dimension_numbers<[0], [0], [1], [1], [0, 1, 1, 1], [], []>} : vector<32x16xf32>, vector<32x16xf32>, vector<16x16xf32> -> vector<16x16xf32>
    %cst_23 = arith.constant 1.000000e+00 : f32
    %67 = vector.broadcast %cst_23 : f32 to vector<16x16xf32>
    %68 = arith.mulf %66, %67 : vector<16x16xf32>
    %cst_24 = arith.constant 2.000000e+00 : f32
    %cst_25 = arith.constant 1.000000e+00 : f32
    %69 = arith.mulf %cst_24, %cst_25 : f32
    %70 = arith.mulf %59, %64 : vector<32x8xf32>
    %71 = vector.shape_cast %70 : vector<32x8xf32> to vector<1x32x8xf32>
    %cst_26 = arith.constant dense<0.000000e+00> : vector<1xf32>
    %72 = vector.multi_reduction <add>, %71, %cst_26 [1, 2] : vector<1x32x8xf32> to vector<1xf32>
    %73 = vector.shape_cast %72 : vector<1xf32> to vector<1x1x1xf32>
    %74 = vector.extract %73[0, 0, 0] : f32 from vector<1x1x1xf32>
    %75 = arith.mulf %69, %74 : f32
    %cst_27 = arith.constant 1.000000e+00 : f32
    %76 = vector.broadcast %cst_27 : f32 to vector<16x16xf32>
    %77 = arith.subf %68, %76 : vector<16x16xf32>
    %78 = math.exp %77 : vector<16x16xf32>
    %cst_28 = arith.constant dense<0.000000e+00> : vector<16xf32>
    %79 = vector.multi_reduction <add>, %78, %cst_28 [1] : vector<16x16xf32> to vector<16xf32>
    %80 = vector.shape_cast %79 : vector<16xf32> to vector<16x1xf32>
    %cst_29 = arith.constant 1.000000e+00 : f32
    %81 = vector.broadcast %cst_29 : f32 to vector<16x1xf32>
    %82 = arith.subf %80, %81 : vector<16x1xf32>
    %cst_30 = arith.constant 1.000000e-30 : f32
    %83 = vector.broadcast %cst_30 : f32 to vector<16x1xf32>
    %84 = arith.maximumf %82, %83 : vector<16x1xf32>
    %cst_31 = arith.constant 1.600000e+01 : f32
    %cst_32 = arith.constant 1.000000e+00 : f32
    %85 = arith.mulf %cst_31, %cst_32 : f32
    %86 = math.log %84 : vector<16x1xf32>
    %87 = vector.shape_cast %86 : vector<16x1xf32> to vector<1x16x1xf32>
    %cst_33 = arith.constant dense<0.000000e+00> : vector<1xf32>
    %88 = vector.multi_reduction <add>, %87, %cst_33 [1, 2] : vector<1x16x1xf32> to vector<1xf32>
    %89 = vector.shape_cast %88 : vector<1xf32> to vector<1x1x1xf32>
    %90 = vector.extract %89[0, 0, 0] : f32 from vector<1x1x1xf32>
    %91 = arith.addf %85, %90 : f32
    %92 = arith.subf %91, %75 : f32
    %cst_34 = arith.constant 1.600000e+01 : f32
    %93 = arith.divf %92, %cst_34 : f32
    %94 = arith.addf %93, %48 : f32
    %cst_35 = arith.constant 5.000000e-01 : f32
    %95 = arith.mulf %94, %cst_35 : f32
    %96 = vector.broadcast %95 : f32 to vector<1x1xf32>
    %c0_36 = arith.constant 0 : index
    %c0_37 = arith.constant 0 : index
    %97 = vector.load %arg2[%c0_36, %c0_37] : memref<1x1xf32, #tpu.memory_space<vmem>>, vector<1x1xf32>
    tpu.vector_store %arg2[%c0_36, %c0_37], %96 {strides = array<i32>} : memref<1x1xf32, #tpu.memory_space<vmem>>, vector<1x1xf32>,
    return
  }
}

</mosaic_0001>

<bundles_post_ra>
// kernel: tpu_custom_call.1
= control target key start
LH: loop header
LB: loop body
LE: loop exit
PB: predicated region body
PF: predicated region fallthrough
CT: control target
= control target key end

     0   :  { %vm20_vm0 = vcmask 64512   ;;  %s568_s0 = inlined_call_operand.vmem [shape: f32[32,8], index: 0, kind: input, shape index: {}]   ;;  %s569_s1 = inlined_call_operand.vmem [shape: f32[32,8], index: 1, kind: input, shape index: {}]   ;;  %s570_s2 = inlined_call_operand.hbm [shape: f32[1,1], index: 2, kind: output, shape index: {}]  }
   0x1   :  { %v16_v0 = vld [vmem:[%s569_s1] sm:$0xff]  ;;  %v17_v1 = vld [vmem:[%s569_s1 + $0x8] sm:$0xff]  ;;  %v18_v2 = vld [vmem:[%s569_s1 + $0x10] sm:$0xff] }
   0x2   :  { %v477_v3 = vld [vmem:[%s569_s1 + $0x18] sm:$0xff]  ;;  %v66_v4 = vsel %vm20_vm0, %v17_v1, 0.0  ;;  %v126_v5 = vmul.f32 %v16_v0, %v16_v0  ;;  %v127_v6 = vmul.f32 %v17_v1, %v17_v1  ;;  %v68_v7 = vsel %vm20_vm0, %v18_v2, 0.0 }
   0x3   :  { %v128_v8 = vmul.f32 %v18_v2, %v18_v2  ;;  %v129_v9 = vmul.f32 %v477_v3, %v477_v3  ;;  %v65_v10 = vsel %vm20_vm0, %v16_v0, 0.0 }
   0x4   :  { %7 = vsyncpa [#allocation3], 0  ;;  %v130_v11 = vsel %vm20_vm0, %v126_v5, 0.0  ;;  %v131_v12 = vsel %vm20_vm0, %v127_v6, 0.0  ;;  %v67_v13 = vadd.f32 %v66_v4, %v65_v10  ;;  %v12_v27 = vld [vmem:[%s568_s0] sm:$0xff]  ;;  %v13_v28 = vld [vmem:[%s568_s0 + $0x8] sm:$0xff] }
   0x5   :  { %v132_v14 = vadd.f32 %v131_v12, %v130_v11  ;;  %v133_v15 = vsel %vm20_vm0, %v128_v8, 0.0  ;;  %v135_v16 = vsel %vm20_vm0, %v129_v9, 0.0  ;;  %v21_v29 = vsel %vm20_vm0, %v12_v27, 0.0  ;;  %v14_v31 = vld [vmem:[%s568_s0 + $0x10] sm:$0xff]  ;;  %v15_v36 = vld [vmem:[%s568_s0 + $0x18] sm:$0xff]  ;;  %s448_s24 = smov 8  }
   0x6   :  { %v488_v17 = vadd.f32 %v68_v7, %v67_v13  ;;  %v22_v30 = vsel %vm20_vm0, %v13_v28, 0.0  ;;  %v24_v34 = vsel %vm20_vm0, %v14_v31, 0.0  ;;  %v26_v41 = vsel %vm20_vm0, %v15_v36, 0.0  ;;  %s449_s10 = smov [#allocation2]  }
   0x7   :  { %v134_v18 = vadd.f32 %v133_v15, %v132_v14  ;;  %v23_v32 = vadd.f32 %v22_v30, %v21_v29  ;;  %vm34_vm1 = vcmask 57344   ;;  %v109_v50 = vmul.f32 %v12_v27, %v12_v27  ;;  %s360_s11 = sshll.u32 %s449_s10, 4  ;;  %s361_s11 = int_to_ptr.vmem [resolvable:$true] %s360_s11 }
   0x8   :  { %v110_v51 = vmul.f32 %v13_v28, %v13_v28  ;;  %v111_v52 = vmul.f32 %v14_v31, %v14_v31  ;;  %v112_v56 = vmul.f32 %v15_v36, %v15_v36  ;;  %vm207_vm2 = vcmask 261120   ;;  %s426_s13 = scalar_lea.vmem %s361_s11, 16  ;;  %s430_s14 = scalar_lea.vmem %s361_s11, 32 }
   0x9   :  { %v136_v19 = vadd.f32 %v135_v16, %v134_v18  ;;  %v25_v40 = vadd.f32 %v24_v34, %v23_v32  ;;  %v113_v53 = vsel %vm20_vm0, %v109_v50, 0.0  ;;  %v70_v29 = vsel %vm20_vm0, %v477_v3, 0.0  ;;  %p427_p0 = scmp.ne.s32.totalorder %s361_s11, %s426_s13  ;;  %p431_p1 = scmp.lt.s32.totalorder %s361_s11, %s361_s11 }
   0xa   :  { %v114_v54 = vsel %vm20_vm0, %v110_v51, 0.0  ;;  %v116_v57 = vsel %vm20_vm0, %v111_v52, 0.0  ;;  %v118_v59 = vsel %vm20_vm0, %v112_v56, 0.0  ;;  %v71_v30 = vadd.f32 %v70_v29, %v488_v17  ;;  %p432_p2 = scmp.lt.s32.totalorder %s430_s14, %s426_s13 }
   0xb   :  { %v137_v20 = vrot.slane %v136_v19, 4  ;;  %v27_v42 = vadd.f32 %v26_v41, %v25_v40  ;;  %v115_v55 = vadd.f32 %v114_v54, %v113_v53  ;;  %vm316_vm4 = vcmask 130048  }
   0xc   :  { %vm331_vm6 = vcmask 7168   ;;  %vm352_vm7 = vcmask 0   ;;  %p433_p3 = por %p432_p2, %p431_p1 }
   0xd   :  { %v138_v21 = vadd.f32 %v137_v20, %v136_v19  ;;  %v28_v43 = vrot.slane %v27_v42, 4  ;;  %v117_v58 = vadd.f32 %v116_v57, %v115_v55 }
   0xe   :  { %p434_p4 = pnand %p433_p3, %p427_p0 }
   0xf   :  { %v139_v22 = vrot.slane %v138_v21, 2  ;;  %v29_v44 = vadd.f32 %v28_v43, %v27_v42  ;;  %v119_v60 = vadd.f32 %v118_v59, %v117_v58 }
  0x11   :  { %v140_v23 = vadd.f32 %v139_v22, %v138_v21  ;;  %v30_v45 = vrot.slane %v29_v44, 2  ;;  %v120_v61 = vrot.slane %v119_v60, 4 }
  0x13   :  { %v141_v24 = vrot.slane %v140_v23, 1  ;;  %v31_v46 = vadd.f32 %v30_v45, %v29_v44  ;;  %v121_v62 = vadd.f32 %v120_v61, %v119_v60 }
  0x15   :  { %v142_v25 = vadd.f32 %v141_v24, %v140_v23  ;;  %v32_v47 = vrot.slane %v31_v46, 1  ;;  %v122_v63 = vrot.slane %v121_v62, 2 }
  0x17   :  { %v149_v26 = vmax.f32 %v142_v25, 1e-16  ;;  %v519_v48 = vadd.f32 %v32_v47, %v31_v46 }
  0x19   :  { %406 = vrsqrt.f32 %v149_v26  ;;  %v35_v49 = vsel %vm34_vm1, %v519_v48, 0.0 }
  0x26   :  { %v407_v33 = vpop.eup %406 }
  0x27   :  { %v502_v35 = vmul.f32 %v407_v33, %v18_v2  ;;  %v507_v37 = vmul.f32 %v407_v33, %v16_v0  ;;  %v512_v38 = vmul.f32 %v407_v33, %v477_v3  ;;  %v514_v39 = vmul.f32 %v407_v33, %v17_v1 }
  0x28   :  { %v123_v0 = vadd.f32 %v122_v63, %v121_v62  ;;  %v72_v33 = vrot.slane %v71_v30, 4 }
  0x29   :  { %163 = vrot.lane.b32.xlu1 %v502_v35, %s448_s24  ;;  %159 = vrot.lane.b32.xlu0 %v507_v37, %s448_s24 }
  0x2a   :  { %v124_v1 = vrot.slane %v123_v0, 1 }
  0x2c   :  { %v125_v2 = vadd.f32 %v124_v1, %v123_v0 }
  0x2d   :  { %165 = vrot.lane.b32.xlu1 %v512_v38, %s448_s24  ;;  %161 = vrot.lane.b32.xlu0 %v514_v39, %s448_s24 }
  0x2e   :  { %v143_v4 = vmax.f32 %v125_v2, 1e-16 }
  0x30   :  { %408 = vrsqrt.f32 %v143_v4 }
  0x3d   :  { %v409_v5 = vpop.eup %408 }
  0x3e   :  { %v527_v6 = vmul.f32 %v409_v5, %v12_v27  ;;  %v529_v9 = vmul.f32 %v409_v5, %v14_v31  ;;  %v531_v10 = vmul.f32 %v409_v5, %v13_v28  ;;  %v535_v12 = vmul.f32 %v409_v5, %v15_v36 }
  0x3f   :  { %v73_v36 = vadd.f32 %v72_v33, %v71_v30 }
  0x41   :  { %v74_v40 = vrot.slane %v73_v36, 2 }
  0x43   :  { %v75_v41 = vadd.f32 %v74_v40, %v73_v36 }
  0x45   :  { %v76_v43 = vrot.slane %v75_v41, 1 }
  0x47   :  { %v77_v46 = vadd.f32 %v76_v43, %v75_v41 }
  0x49   :  { %v78_v17 = vsel %vm34_vm1, %v77_v46, 0.0 }
  0x4c   :  { %36 = vadd.xlane.f32.xlu0 %v35_v49 }
  0x9b   :  { %v164_v7 = vpop.permute.xlu1 %163  ;;  %v160_v8 = vpop.permute.xlu0 %159 }
  0x9c   :  { %v171_v11 = vsel %vm20_vm0, %v527_v6, %v160_v8  ;;  %v173_v18 = vsel %vm20_vm0, %v529_v9, %v164_v7 }
  0x9d   :  { %175 = vxpose.xlu1.b32.start [1/4] (short) (narrow) %v171_v11, 16 }
  0x9f   :  { %v166_v13 = vpop.permute.xlu1 %165  ;;  %v162_v14 = vpop.permute.xlu0 %161 }
  0xa0   :  { %v174_v15 = vsel %vm20_vm0, %v535_v12, %v166_v13  ;;  %v172_v16 = vsel %vm20_vm0, %v531_v10, %v162_v14  ;;  %v289_v13 = vmul.f32 %v507_v37, %v527_v6  ;;  %v291_v14 = vmul.f32 %v502_v35, %v529_v9 }
  0xa1   :  { %380 = vmatprep.subr.mxu0 %v174_v15  ;;  %176 = vxpose.xlu1.b32.cont [2/4] (short) (narrow) %v172_v16, 16 }
  0xa2   :  { %381 = vmatpush3.msra.mxu0 %v174_v15 }
  0xa3   :  { %382 = vmatprep.subr.mxu0 %v173_v18 }
  0xa4   :  { %383 = vmatpush3.msra.mxu0 %v173_v18 }
  0xa5   :  { %384 = vmatprep.subr.mxu0 %v172_v16  ;;  %177 = vxpose.xlu1.b32.cont [3/4] (short) (narrow) %v173_v18, 16 }
  0xa6   :  { %385 = vmatpush3.msra.mxu0 %v172_v16  ;;  %v293_v16 = vsel %vm20_vm0, %v289_v13, 0.0 }
  0xa7   :  { %386 = vmatprep.subr.mxu0 %v171_v11 }
  0xa8   :  { %387 = vmatpush3.msra.mxu0 %v171_v11 }
  0xa9   :  { %178 = vxpose.xlu1.b32.end [4/4] (short) (narrow) %v174_v15, 16  ;;  %v290_v15 = vmul.f32 %v514_v39, %v531_v10  ;;  %v292_v39 = vmul.f32 %v512_v38, %v535_v12 }
  0xab   :  { %v294_v18 = vsel %vm20_vm0, %v290_v15, 0.0 }
  0xd5   :  { %v37_v19 = vpop.xlane.xlu0 %36 }
  0xd6   :  { %v38_v20 = vrot.slane %v37_v19, 4 }
  0xd8   :  { %v39_v21 = vadd.f32 %v38_v20, %v37_v19  ;;  %v296_v19 = vsel %vm20_vm0, %v291_v14, 0.0 }
  0xda   :  { %v40_v22 = vrot.slane %v39_v21, 2 }
  0xdc   :  { %v41_v23 = vadd.f32 %v40_v22, %v39_v21  ;;  %v295_v21 = vadd.f32 %v294_v18, %v293_v16 }
  0xde   :  { %v42_v24 = vrot.slane %v41_v23, 1  ;;  %v297_v22 = vadd.f32 %v296_v19, %v295_v21 }
  0xe0   :  { %v43_v25 = vadd.f32 %v42_v24, %v41_v23  ;;  %v298_v24 = vsel %vm20_vm0, %v292_v39, 0.0 }
  0xe2   :  { %391 = vpush %v43_v25 }
 0x113   :  { %s392_s0 = spop %391 }
 0x114   :  { %v45_v26 = vstv %s392_s0 }
 0x115   :  { %410 = vrcp.f32 %v45_v26 }
 0x119   :  { %v191_v27 = vpop.trf.xlu1 }
 0x11a   :  { %388 = vmatprep.mubr.msk.f32.mxu0 %vm207_vm2, %v191_v27  ;;  %v299_v27 = vadd.f32 %v298_v24, %v297_v22 }
 0x11d   :  { %v192_v28 = vpop.trf.xlu1 }
 0x11e   :  { %389 = vmatmul.mubr.msk.f32.vlgmr.msra.gmra.mxu0 %vm207_vm2, %v192_v28 }
 0x122   :  { %v411_v31 = vpop.eup %410 }
 0x123   :  { %v47_v32 = vmul.f32 %v411_v31, %v519_v48 }
 0x125   :  { %vm48_vm3 = vcmp.gt.f32.partialorder %v47_v32, 0.0 }
 0x126   :  { %v49_v34 = vsel %vm48_vm3, %v47_v32, 1.0 }
 0x127   :  { %412 = vlog2.f32 %v49_v34 }
 0x134   :  { %v413_v42 = vpop.eup %412 }
 0x135   :  { %v51_v44 = vmul.f32 0.6931472, %v413_v42 }
 0x137   :  { %v52_v45 = vmul.f32 %v51_v44, %v47_v32 }
 0x139   :  { %v53_v47 = vsel %vm48_vm3, %v52_v45, 0.0 }
 0x13a   :  { %v54_v3 = vsel %vm34_vm1, %v53_v47, 0.0 }
 0x13b   :  { %55 = vadd.xlane.f32.xlu0 %v54_v3 }
 0x13f   :  { %79 = vadd.xlane.f32.xlu0 %v78_v17 }
 0x1c4   :  { %v56_v48 = vpop.xlane.xlu0 %55 }
 0x1c5   :  { %v57_v49 = vrot.slane %v56_v48, 4 }
 0x1c7   :  { %v58_v50 = vadd.f32 %v57_v49, %v56_v48 }
 0x1c8   :  { %v80_v51 = vpop.xlane.xlu0 %79 }
 0x1c9   :  { %v59_v52 = vrot.slane %v58_v50, 2  ;;  %v81_v53 = vrot.slane %v80_v51, 4 }
 0x1cb   :  { %v82_v54 = vadd.f32 %v81_v53, %v80_v51  ;;  %v60_v55 = vadd.f32 %v59_v52, %v58_v50 }
 0x1cd   :  { %v83_v56 = vrot.slane %v82_v54, 2  ;;  %v61_v57 = vrot.slane %v60_v55, 1 }
 0x1cf   :  { %v62_v58 = vadd.f32 %v61_v57, %v60_v55  ;;  %v84_v59 = vadd.f32 %v83_v56, %v82_v54 }
 0x1d1   :  { %393 = vpush %v62_v58  ;;  %v85_v60 = vrot.slane %v84_v59, 1 }
 0x1d3   :  { %v86_v61 = vadd.f32 %v85_v60, %v84_v59 }
 0x1d5   :  { %395 = vpush %v86_v61 }
 0x1de   :  { %v390_v62 = vpop.f32.mrf.mxu0 }
 0x1df   :  { %v371_v63 = vadd.f32 -1.0, %v390_v62 }
 0x1e0   :  { %v280_v0 = vpop.f32.mrf.mxu0 }
 0x1e1   :  { %v370_v1 = vadd.f32 -1.0, %v280_v0  ;;  %v314_v2 = vmul.f32 1.442695, %v371_v63 }
 0x1e3   :  { %v312_v4 = vmul.f32 1.442695, %v370_v1 }
 0x1e5   :  { %414 = vpow2.f32 %v312_v4 }
 0x1e6   :  { %416 = vpow2.f32 %v314_v2 }
 0x1f2   :  { %v415_v5 = vpop.eup %414 }
 0x1f3   :  { %v317_v7 = vsel %vm316_vm4, %v415_v5, 0.0  ;;  %v417_v8 = vpop.eup %416 }
 0x1f4   :  { %318 = vadd.xlane.f32.xlu0 %v317_v7  ;;  %v320_v11 = vsel %vm316_vm4, %v417_v8, 0.0 }
 0x1f8   :  { %321 = vadd.xlane.f32.xlu0 %v320_v11 }
 0x202   :  { %s556_s25 = spop %393 }
 0x203   :  { %s64_s5 = sadd.f32 2.0794415, %s556_s25 }
 0x206   :  { %s396_s26 = spop %395 }
 0x207   :  { %v88_v20 = vstv %s396_s26 }
 0x208   :  { %418 = vrcp.f32 %v88_v20 }
 0x215   :  { %v419_v37 = vpop.eup %418 }
 0x216   :  { %v90_v6 = vmul.f32 %v419_v37, %v77_v46 }
 0x218   :  { %vm91_vm5 = vcmp.gt.f32.partialorder %v90_v6, 0.0 }
 0x219   :  { %v92_v35 = vsel %vm91_vm5, %v90_v6, 1.0 }
 0x21a   :  { %420 = vlog2.f32 %v92_v35 }
 0x227   :  { %v421_v9 = vpop.eup %420 }
 0x228   :  { %v94_v10 = vmul.f32 0.6931472, %v421_v9 }
 0x22a   :  { %v95_v23 = vmul.f32 %v94_v10, %v90_v6 }
 0x22c   :  { %v96_v25 = vsel %vm91_vm5, %v95_v23, 0.0 }
 0x22d   :  { %v97_v26 = vsel %vm34_vm1, %v96_v25, 0.0 }
 0x22e   :  { %98 = vadd.xlane.f32.xlu0 %v97_v26 }
 0x232   :  { %300 = vadd.xlane.f32.xlu0 %v299_v27 }
 0x27d   :  { %v319_v28 = vpop.xlane.xlu0 %318 }
 0x27e   :  { %v372_v29 = vadd.f32 -1.0, %v319_v28 }
 0x280   :  { %v325_v30 = vmax.f32 %v372_v29, 1e-30 }
 0x281   :  { %v322_v31 = vpop.xlane.xlu0 %321 }
 0x282   :  { %422 = vlog2.f32 %v325_v30  ;;  %v373_v32 = vadd.f32 -1.0, %v322_v31 }
 0x284   :  { %v326_v33 = vmax.f32 %v373_v32, 1e-30 }
 0x286   :  { %424 = vlog2.f32 %v326_v33 }
 0x28f   :  { %v423_v34 = vpop.eup %422 }
 0x290   :  { %v328_v38 = vmul.f32 0.6931472, %v423_v34 }
 0x292   :  { %v332_v40 = vsel %vm331_vm6, %v328_v38, 0.0 }
 0x293   :  { %v425_v12 = vpop.eup %424 }
 0x294   :  { %v330_v36 = vmul.f32 0.6931472, %v425_v12 }
 0x296   :  { %v333_v41 = vsel %vm331_vm6, %v330_v36, 0.0 }
 0x297   :  { %v334_v42 = vadd.f32 %v333_v41, %v332_v40 }
 0x299   :  { %335 = vadd.xlane.f32.xlu1 %v334_v42 }
 0x2b7   :  { %v99_v43 = vpop.xlane.xlu0 %98 }
 0x2b8   :  { %v100_v44 = vrot.slane %v99_v43, 4 }
 0x2ba   :  { %v101_v45 = vadd.f32 %v100_v44, %v99_v43 }
 0x2bb   :  { %v301_v46 = vpop.xlane.xlu0 %300 }
 0x2bc   :  { %v102_v47 = vrot.slane %v101_v45, 2  ;;  %v302_v3 = vrot.slane %v301_v46, 4 }
 0x2be   :  { %v103_v17 = vadd.f32 %v102_v47, %v101_v45  ;;  %v303_v48 = vadd.f32 %v302_v3, %v301_v46 }
 0x2c0   :  { %v104_v49 = vrot.slane %v103_v17, 1  ;;  %v304_v50 = vrot.slane %v303_v48, 2 }
 0x2c2   :  { %v105_v51 = vadd.f32 %v104_v49, %v103_v17  ;;  %v305_v52 = vadd.f32 %v304_v50, %v303_v48 }
 0x2c4   :  { %397 = vpush %v105_v51  ;;  %v306_v53 = vrot.slane %v305_v52, 1 }
 0x2c6   :  { %v307_v54 = vadd.f32 %v306_v53, %v305_v52 }
 0x2c8   :  { %399 = vpush %v307_v54 }
 0x2f5   :  { %s398_s27 = spop %397 }
 0x2f6   :  { %s107_s29 = sadd.f32 2.0794415, %s398_s27 }
 0x2f8   :  { %s108_s7 = sadd.f32 %s107_s29, %s64_s5 }
 0x2f9   :  { %s400_s28 = spop %399 }
 0x2fa   :  { %s309_s3 = smul.f32 2.0, %s400_s28 }
 0x322   :  { %v336_v55 = vpop.xlane.xlu1 %335 }
 0x323   :  { %v337_v56 = vrot.slane %v336_v55, 4 }
 0x325   :  { %v338_v57 = vadd.f32 %v337_v56, %v336_v55 }
 0x327   :  { %v339_v58 = vrot.slane %v338_v57, 2 }
 0x329   :  { %v340_v59 = vadd.f32 %v339_v58, %v338_v57 }
 0x32b   :  { %v341_v60 = vrot.slane %v340_v59, 1 }
 0x32d   :  { %v342_v61 = vadd.f32 %v341_v60, %v340_v59 }
 0x32f   :  { %401 = vpush %v342_v61 }
 0x360   :  { %s402_s30 = spop %401 }
 0x361   :  { %s344_s4 = sadd.f32 16.0, %s402_s30 }
 0x363   :  { %s345_s6 = ssub.f32 %s344_s4, %s309_s3 }
 0x365   :  { %s348_s8 = smul.f32 0.0625, %s345_s6 }
 0x367   :  { %s349_s9 = sadd.f32 %s348_s8, %s108_s7 }
 0x369   :  { %s350_s12 = smul.f32 0.5, %s349_s9 }
 0x36b   :  { %v351_v62 = vstv %s350_s12 }
 0x36c   :  { %353 = vst.msk [vmem:[#allocation2] sm:$0x1] %vm352_vm7, %v351_v62 }
 0x36d   :  { %437 = shalt.err (!%p434_p4)
}
 0x36e   :  { %363 = dma.vmem_to_hbm [thread:$0]  %s361_s11, 16, %s570_s2, [#allocation3]  }
 0x36f   :  { %446 = dma.done.wait [#allocation3], 16  }
 0x370   :  { %447 = vsyncadd [#allocation3], 4294967280 }
 0x371   :  { %367 = vsyncpa [#allocation3], 1 }

</bundles_post_ra>
